<compile_context>
chip_gen: v6e
topology: v6e:2x2x1
jax: 0.10.0
libtpu: 0.0.40
codegen_flags: <defaults>
</compile_context>

<pallas_src>
import jax
import jax.numpy as jnp
from jax.experimental import pallas as pl
from jax.experimental.pallas import tpu as pltpu


# ----------------------------------------------------------------------------
# Fused kernel: interpolation + (folded concat) + conv1x1/BN/ReLU stack
# ----------------------------------------------------------------------------
def _make_fp_kernel(num_layers, has_small):
    def kernel(*refs):
        i = 0
        co_s_ref = refs[i]; i += 1          # (1, tn, 3)
        co_b_ref = refs[i]; i += 1          # (1, m, 3)
        fea_b_ref = refs[i]; i += 1         # (1, m, c)
        fea_s_ref = None
        if has_small:
            fea_s_ref = refs[i]; i += 1     # (1, tn, c_small)
        param_refs = refs[i:-1]
        out_ref = refs[-1]                  # (1, tn, cout_last)

        co_s = co_s_ref[0].astype(jnp.float32)      # (tn, 3)
        co_b = co_b_ref[0].astype(jnp.float32)      # (m, 3)
        fea_b = fea_b_ref[0]                        # (m, c)  keep input dtype for MXU

        tn = co_s.shape[0]
        m = co_b.shape[0]

        # ---- pairwise squared distance via matmul expansion (on the MXU) ----
        s2 = jnp.sum(co_s * co_s, axis=-1, keepdims=True)            # (tn, 1)
        b2 = jnp.sum(co_b * co_b, axis=-1)[None, :]                  # (1, m)
        cross = jax.lax.dot_general(co_s, co_b, (((1,), (1,)), ((), ())),
                                    preferred_element_type=jnp.float32)  # (tn, m)
        d = jnp.maximum(s2 + b2 - 2.0 * cross, 0.0)                  # (tn, m)

        iota = jax.lax.broadcasted_iota(jnp.int32, (tn, m), 1)

        # ---- 3 nearest neighbors (stable: lowest index on ties), matching
        #      torch.sort(distance, axis=2)[:, :, 0:3]; accumulate inverse-
        #      distance weights directly into a dense (tn, m) weight matrix ----
        remaining = d
        wsum = jnp.zeros((tn, m), jnp.float32)
        nearest_sel = None
        for k in range(3):
            dmin = jnp.min(remaining, axis=-1, keepdims=True)                 # (tn, 1)
            idx = jnp.min(jnp.where(remaining == dmin, iota, m),
                          axis=-1, keepdims=True)                             # (tn, 1)
            sel = (iota == idx).astype(jnp.float32)                           # (tn, m)
            if k == 0:
                nearest_sel = sel
            # Rows whose nearest distance is 0 are overridden by the one-hot
            # branch below; clamp just to avoid inf/NaN in the blended branch.
            safe = jnp.where(dmin <= 0.0, 1.0, dmin)
            wsum = wsum + sel * (1.0 / safe)
            remaining = jnp.where(sel > 0.0, jnp.float32(jnp.inf), remaining)

        # Exact nearest-neighbor distance (robust "is_big" exact-match test,
        # independent of MXU rounding in the matmul-form distances).
        nearest_co = jnp.dot(nearest_sel, co_b,
                             preferred_element_type=jnp.float32)              # (tn, 3)
        nd = co_s - nearest_co
        exact_d0 = jnp.sum(nd * nd, axis=-1, keepdims=True)                   # (tn, 1)
        is_big = exact_d0 <= 0.0

        # Combined per-row weights -> ONE (tn, m) x (m, c) interpolation matmul.
        inv_norm = 1.0 / jnp.sum(wsum, axis=-1, keepdims=True)                # (tn, 1)
        weights = jnp.where(is_big, nearest_sel, wsum * inv_norm)             # (tn, m)
        features = jnp.dot(weights.astype(fea_b.dtype), fea_b,
                           preferred_element_type=jnp.float32)                # (tn, c)

        # ---- MLP stack: conv1x1 (matmul) + folded BN + ReLU, chained in VMEM.
        # The concat([fea_small, features]) is folded into layer 0 by splitting
        # its weight matrix into (c_small, cout0) and (c_big, cout0) halves.
        p = 0
        if has_small:
            w0a = param_refs[p][...]; p += 1     # (c_small, cout0)
            w0b = param_refs[p][...]; p += 1     # (c_big,   cout0)
            b0 = param_refs[p][...]; p += 1      # (1, cout0)
            fea_s = fea_s_ref[0]
            y = (jnp.dot(fea_s.astype(w0a.dtype), w0a,
                         preferred_element_type=jnp.float32)
                 + jnp.dot(features.astype(w0b.dtype), w0b,
                           preferred_element_type=jnp.float32))
        else:
            w0b = param_refs[p][...]; p += 1
            b0 = param_refs[p][...]; p += 1
            y = jnp.dot(features.astype(w0b.dtype), w0b,
                        preferred_element_type=jnp.float32)
        x = jnp.maximum(y + b0.astype(jnp.float32), 0.0)

        for _ in range(1, num_layers):
            w = param_refs[p][...]; p += 1
            bv = param_refs[p][...]; p += 1
            y = jnp.dot(x.astype(w.dtype), w, preferred_element_type=jnp.float32)
            x = jnp.maximum(y + bv.astype(jnp.float32), 0.0)

        out_ref[0] = x.astype(out_ref.dtype)

    return kernel


def _choose_tile_n(n):
    # Tile over the point axis so the (TN, m) working set is bounded and the
    # pipeline has enough steps to overlap DMA with compute.  Pick the largest
    # divisor of n that is a multiple of 8 and <= 512; otherwise run untiled.
    if n <= 512:
        return n
    t = 512
    while t >= 8:
        if n % t == 0:
            return t
        t -= 8
    # TODO(synk): pad n to a multiple of 8 for point counts with no suitable
    # divisor; fall back to untiled for now.
    return n


# ----------------------------------------------------------------------------
# FP forward
# ----------------------------------------------------------------------------
@jax.jit
def fp_forward(params, pts_co_small, pts_fea_small, pts_co_big, pts_fea_big):
    b, n, _ = pts_co_small.shape
    _, m, c_big = pts_fea_big.shape
    has_small = pts_fea_small is not None
    c_small = pts_fea_small.shape[2] if has_small else 0
    num_layers = len(params)
    cout_last = params[-1][0].shape[1]

    tn = _choose_tile_n(n)
    n_tiles = n // tn

    kernel = _make_fp_kernel(num_layers, has_small)

    inputs = [pts_co_small, pts_co_big, pts_fea_big]
    in_specs = [
        pl.BlockSpec((1, tn, 3), lambda bi, ti: (bi, ti, 0)),
        # Big-point blocks: constant across the n-tile axis -> stay resident
        # in VMEM while iterating n-tiles of the same batch (no re-DMA).
        pl.BlockSpec((1, m, 3), lambda bi, ti: (bi, 0, 0)),
        pl.BlockSpec((1, m, c_big), lambda bi, ti: (bi, 0, 0)),
    ]
    if has_small:
        inputs.append(pts_fea_small)
        in_specs.append(pl.BlockSpec((1, tn, c_small), lambda bi, ti: (bi, ti, 0)))

    # Layer parameters: layer 0's weight is split so the concat folds away.
    w0, b0 = params[0]
    if has_small:
        param_arrays = [w0[:c_small], w0[c_small:], b0]
    else:
        param_arrays = [w0, b0]
    for (w, bv) in params[1:]:
        param_arrays.extend([w, bv])
    param_spec_map = lambda bi, ti: (0, 0)   # all params are 2-D, full-block
    for arr in param_arrays:
        inputs.append(arr)
        in_specs.append(pl.BlockSpec(arr.shape, param_spec_map))

    out_spec = pl.BlockSpec((1, tn, cout_last), lambda bi, ti: (bi, ti, 0))

    # Advisory cost estimate (distance matmul + interpolation matmul + MLP).
    flops = 2 * b * n * m * 3 + 2 * b * n * m * c_big
    cin = c_small + c_big
    for (w, _) in params:
        co = int(w.shape[1])
        flops += 2 * b * n * cin * co
        cin = co
    bytes_accessed = sum(int(a.size) * a.dtype.itemsize for a in inputs)
    bytes_accessed += b * n * cout_last * jnp.dtype(pts_fea_big.dtype).itemsize

    return pl.pallas_call(
        kernel,
        out_shape=jax.ShapeDtypeStruct((b, n, cout_last), pts_fea_big.dtype),
        grid=(b, n_tiles),
        in_specs=in_specs,
        out_specs=out_spec,
        compiler_params=pltpu.CompilerParams(
            dimension_semantics=("parallel", "parallel"),
            vmem_limit_bytes=32 * 1024 * 1024,
        ),
        cost_estimate=pl.CostEstimate(
            flops=int(flops), transcendentals=0, bytes_accessed=int(bytes_accessed)),
    )(*inputs)


# ----------------------------------------------------------------------------
# Parameter setup (deterministic, BN folded, inference stats)
# ----------------------------------------------------------------------------
def init_params(key, layer_sizes, in_channels, eps=1e-5):
    params = []
    in_fea = in_channels
    for out_fea in layer_sizes:
        key, k1, k2, k3, k4 = jax.random.split(key, 5)
        w = 0.1 * jax.random.normal(k1, (out_fea, in_fea), jnp.float32)   # Conv1d (cout, cin)
        bias = 0.1 * jax.random.normal(k2, (out_fea,), jnp.float32)
        gamma = 1.0 + 0.1 * jax.random.normal(k3, (out_fea,), jnp.float32)
        beta = 0.1 * jax.random.normal(k4, (out_fea,), jnp.float32)
        running_mean = jnp.zeros((out_fea,), jnp.float32)
        running_var = jnp.ones((out_fea,), jnp.float32)

        scale = gamma / jnp.sqrt(running_var + eps)
        w_eff = (w * scale[:, None]).T                                     # (cin, cout)
        b_eff = ((bias - running_mean) * scale + beta).reshape(1, out_fea)
        params.append((w_eff, b_eff))
        in_fea = out_fea
    return params


if __name__ == "__main__":
    key = jax.random.PRNGKey(0)
    ks = jax.random.split(key, 5)

    b, n, m = 2, 16, 8
    c_big, c_small = 8, 8
    layer_sizes = [32, 16]
    in_channels = c_small + c_big

    pts_co_small = jax.random.normal(ks[0], (b, n, 3), jnp.float32)
    pts_co_big = jax.random.normal(ks[1], (b, m, 3), jnp.float32)
    # Make one small point coincide with a big point to exercise the is_big branch.
    pts_co_small = pts_co_small.at[0, 0].set(pts_co_big[0, 3])
    pts_fea_small = jax.random.normal(ks[2], (b, n, c_small), jnp.float32)
    pts_fea_big = jax.random.normal(ks[3], (b, m, c_big), jnp.float32)

    params = init_params(ks[4], layer_sizes, in_channels)

    out = fp_forward(params, pts_co_small, pts_fea_small, pts_co_big, pts_fea_big)
    jax.block_until_ready(out)
    assert out.shape == (b, n, layer_sizes[-1])
    assert bool(jnp.all(jnp.isfinite(out)))
    print("KERNEL_OK")
</pallas_src>

<mosaic_0001>
module attributes {stable_mosaic.version = 11 : i64} {
  func.func @kernel(%arg0: i32, %arg1: i32, %arg2: memref<1x16x3xf32, #tpu.memory_space<vmem>>, %arg3: memref<1x8x3xf32, #tpu.memory_space<vmem>>, %arg4: memref<1x8x8xf32, #tpu.memory_space<vmem>>, %arg5: memref<1x16x8xf32, #tpu.memory_space<vmem>>, %arg6: memref<8x32xf32, #tpu.memory_space<vmem>>, %arg7: memref<8x32xf32, #tpu.memory_space<vmem>>, %arg8: memref<1x32xf32, #tpu.memory_space<vmem>>, %arg9: memref<32x16xf32, #tpu.memory_space<vmem>>, %arg10: memref<1x16xf32, #tpu.memory_space<vmem>>, %arg11: memref<1x16x16xf32, #tpu.memory_space<vmem>>) attributes {dimension_semantics = [#tpu.dimension_semantics<parallel>, #tpu.dimension_semantics<parallel>], iteration_bounds = array<i64: 2, 1>, scalar_prefetch = 0 : i64, scratch_operands = 0 : i64, tpu.core_type = #tpu.core_type<tc>, window_params = [{transform_indices = @transform_0, window_bounds = array<i64: 1, 16, 3>}, {transform_indices = @transform_1, window_bounds = array<i64: 1, 8, 3>}, {transform_indices = @transform_2, window_bounds = array<i64: 1, 8, 8>}, {transform_indices = @transform_3, window_bounds = array<i64: 1, 16, 8>}, {pipeline_mode = #tpu.pipeline_mode<synchronous>, transform_indices = @transform_4, window_bounds = array<i64: 8, 32>}, {pipeline_mode = #tpu.pipeline_mode<synchronous>, transform_indices = @transform_5, window_bounds = array<i64: 8, 32>}, {pipeline_mode = #tpu.pipeline_mode<synchronous>, transform_indices = @transform_6, window_bounds = array<i64: 1, 32>}, {pipeline_mode = #tpu.pipeline_mode<synchronous>, transform_indices = @transform_7, window_bounds = array<i64: 32, 16>}, {pipeline_mode = #tpu.pipeline_mode<synchronous>, transform_indices = @transform_8, window_bounds = array<i64: 1, 16>}, {transform_indices = @transform_9, window_bounds = array<i64: 1, 16, 16>}]} {
    %c0 = arith.constant 0 : index
    %c0_0 = arith.constant 0 : index
    %c0_1 = arith.constant 0 : index
    %0 = vector.load %arg2[%c0, %c0_0, %c0_1] : memref<1x16x3xf32, #tpu.memory_space<vmem>>, vector<1x16x3xf32>
    %1 = vector.shape_cast %0 : vector<1x16x3xf32> to vector<16x3xf32>
    %c0_2 = arith.constant 0 : index
    %c0_3 = arith.constant 0 : index
    %c0_4 = arith.constant 0 : index
    %2 = vector.load %arg3[%c0_2, %c0_3, %c0_4] : memref<1x8x3xf32, #tpu.memory_space<vmem>>, vector<1x8x3xf32>
    %3 = vector.shape_cast %2 : vector<1x8x3xf32> to vector<8x3xf32>
    %c0_5 = arith.constant 0 : index
    %c0_6 = arith.constant 0 : index
    %c0_7 = arith.constant 0 : index
    %4 = vector.load %arg4[%c0_5, %c0_6, %c0_7] : memref<1x8x8xf32, #tpu.memory_space<vmem>>, vector<1x8x8xf32>
    %5 = vector.shape_cast %4 : vector<1x8x8xf32> to vector<8x8xf32>
    %6 = arith.mulf %1, %1 : vector<16x3xf32>
    %cst = arith.constant dense<0.000000e+00> : vector<16xf32>
    %7 = vector.multi_reduction <add>, %6, %cst [1] : vector<16x3xf32> to vector<16xf32>
    %8 = vector.shape_cast %7 : vector<16xf32> to vector<16x1xf32>
    %9 = arith.mulf %3, %3 : vector<8x3xf32>
    %cst_8 = arith.constant dense<0.000000e+00> : vector<8xf32>
    %10 = vector.multi_reduction <add>, %9, %cst_8 [1] : vector<8x3xf32> to vector<8xf32>
    %11 = vector.shape_cast %10 : vector<8xf32> to vector<1x8xf32>
    %cst_9 = arith.constant dense<0.000000e+00> : vector<16x8xf32>
    %12 = tpu.matmul %1, %3, %cst_9 {dimension_numbers = #tpu.dot_dimension_numbers<[1], [1], [0], [0], [0, 0, 1, 0], [], []>} : vector<16x3xf32>, vector<8x3xf32>, vector<16x8xf32> -> vector<16x8xf32>
    %13 = vector.broadcast %8 : vector<16x1xf32> to vector<16x8xf32>
    %14 = vector.broadcast %11 : vector<1x8xf32> to vector<16x8xf32>
    %15 = arith.addf %13, %14 : vector<16x8xf32>
    %cst_10 = arith.constant 2.000000e+00 : f32
    %16 = vector.broadcast %cst_10 : f32 to vector<16x8xf32>
    %17 = arith.mulf %16, %12 : vector<16x8xf32>
    %18 = arith.subf %15, %17 : vector<16x8xf32>
    %cst_11 = arith.constant 0.000000e+00 : f32
    %19 = vector.broadcast %cst_11 : f32 to vector<16x8xf32>
    %20 = arith.maximumf %18, %19 : vector<16x8xf32>
    %21 = tpu.iota {dimensions = array<i32: 1>} : vector<16x8xi32>
    %cst_12 = arith.constant 0.000000e+00 : f32
    %22 = vector.broadcast %cst_12 : f32 to vector<16x8xf32>
    %cst_13 = arith.constant dense<0x7F800000> : vector<16xf32>
    %23 = vector.multi_reduction <minimumf>, %20, %cst_13 [1] : vector<16x8xf32> to vector<16xf32>
    %24 = vector.shape_cast %23 : vector<16xf32> to vector<16x1xf32>
    %25 = vector.broadcast %24 : vector<16x1xf32> to vector<16x8xf32>
    %26 = arith.cmpf oeq, %20, %25 : vector<16x8xf32>
    %c8_i32 = arith.constant 8 : i32
    %27 = vector.broadcast %c8_i32 : i32 to vector<16x8xi32>
    %28 = arith.select %26, %21, %27 : vector<16x8xi1>, vector<16x8xi32>
    %cst_14 = arith.constant dense<2147483647> : vector<16xi32>
    %29 = vector.multi_reduction <minsi>, %28, %cst_14 [1] : vector<16x8xi32> to vector<16xi32>
    %30 = vector.shape_cast %29 : vector<16xi32> to vector<16x1xi32>
    %31 = vector.broadcast %30 : vector<16x1xi32> to vector<16x8xi32>
    %32 = arith.cmpi eq, %21, %31 : vector<16x8xi32>
    %33 = arith.extui %32 : vector<16x8xi1> to vector<16x8xi32>
    %34 = arith.sitofp %33 : vector<16x8xi32> to vector<16x8xf32>
    %cst_15 = arith.constant 0.000000e+00 : f32
    %35 = vector.broadcast %cst_15 : f32 to vector<16x1xf32>
    %36 = arith.cmpf ole, %24, %35 : vector<16x1xf32>
    %cst_16 = arith.constant 1.000000e+00 : f32
    %37 = vector.broadcast %cst_16 : f32 to vector<16x1xf32>
    %38 = arith.select %36, %37, %24 : vector<16x1xi1>, vector<16x1xf32>
    %cst_17 = arith.constant 1.000000e+00 : f32
    %39 = vector.broadcast %cst_17 : f32 to vector<16x1xf32>
    %40 = arith.divf %39, %38 : vector<16x1xf32>
    %41 = vector.broadcast %40 : vector<16x1xf32> to vector<16x8xf32>
    %42 = arith.mulf %34, %41 : vector<16x8xf32>
    %43 = arith.addf %22, %42 : vector<16x8xf32>
    %cst_18 = arith.constant 0.000000e+00 : f32
    %44 = vector.broadcast %cst_18 : f32 to vector<16x8xf32>
    %45 = arith.cmpf ogt, %34, %44 : vector<16x8xf32>
    %cst_19 = arith.constant 0x7F800000 : f32
    %46 = vector.broadcast %cst_19 : f32 to vector<16x8xf32>
    %47 = arith.select %45, %46, %20 : vector<16x8xi1>, vector<16x8xf32>
    %cst_20 = arith.constant dense<0x7F800000> : vector<16xf32>
    %48 = vector.multi_reduction <minimumf>, %47, %cst_20 [1] : vector<16x8xf32> to vector<16xf32>
    %49 = vector.shape_cast %48 : vector<16xf32> to vector<16x1xf32>
    %50 = vector.broadcast %49 : vector<16x1xf32> to vector<16x8xf32>
    %51 = arith.cmpf oeq, %47, %50 : vector<16x8xf32>
    %c8_i32_21 = arith.constant 8 : i32
    %52 = vector.broadcast %c8_i32_21 : i32 to vector<16x8xi32>
    %53 = arith.select %51, %21, %52 : vector<16x8xi1>, vector<16x8xi32>
    %cst_22 = arith.constant dense<2147483647> : vector<16xi32>
    %54 = vector.multi_reduction <minsi>, %53, %cst_22 [1] : vector<16x8xi32> to vector<16xi32>
    %55 = vector.shape_cast %54 : vector<16xi32> to vector<16x1xi32>
    %56 = vector.broadcast %55 : vector<16x1xi32> to vector<16x8xi32>
    %57 = arith.cmpi eq, %21, %56 : vector<16x8xi32>
    %58 = arith.extui %57 : vector<16x8xi1> to vector<16x8xi32>
    %59 = arith.sitofp %58 : vector<16x8xi32> to vector<16x8xf32>
    %cst_23 = arith.constant 0.000000e+00 : f32
    %60 = vector.broadcast %cst_23 : f32 to vector<16x1xf32>
    %61 = arith.cmpf ole, %49, %60 : vector<16x1xf32>
    %cst_24 = arith.constant 1.000000e+00 : f32
    %62 = vector.broadcast %cst_24 : f32 to vector<16x1xf32>
    %63 = arith.select %61, %62, %49 : vector<16x1xi1>, vector<16x1xf32>
    %cst_25 = arith.constant 1.000000e+00 : f32
    %64 = vector.broadcast %cst_25 : f32 to vector<16x1xf32>
    %65 = arith.divf %64, %63 : vector<16x1xf32>
    %66 = vector.broadcast %65 : vector<16x1xf32> to vector<16x8xf32>
    %67 = arith.mulf %59, %66 : vector<16x8xf32>
    %68 = arith.addf %43, %67 : vector<16x8xf32>
    %cst_26 = arith.constant 0.000000e+00 : f32
    %69 = vector.broadcast %cst_26 : f32 to vector<16x8xf32>
    %70 = arith.cmpf ogt, %59, %69 : vector<16x8xf32>
    %cst_27 = arith.constant 0x7F800000 : f32
    %71 = vector.broadcast %cst_27 : f32 to vector<16x8xf32>
    %72 = arith.select %70, %71, %47 : vector<16x8xi1>, vector<16x8xf32>
    %cst_28 = arith.constant dense<0x7F800000> : vector<16xf32>
    %73 = vector.multi_reduction <minimumf>, %72, %cst_28 [1] : vector<16x8xf32> to vector<16xf32>
    %74 = vector.shape_cast %73 : vector<16xf32> to vector<16x1xf32>
    %75 = vector.broadcast %74 : vector<16x1xf32> to vector<16x8xf32>
    %76 = arith.cmpf oeq, %72, %75 : vector<16x8xf32>
    %c8_i32_29 = arith.constant 8 : i32
    %77 = vector.broadcast %c8_i32_29 : i32 to vector<16x8xi32>
    %78 = arith.select %76, %21, %77 : vector<16x8xi1>, vector<16x8xi32>
    %cst_30 = arith.constant dense<2147483647> : vector<16xi32>
    %79 = vector.multi_reduction <minsi>, %78, %cst_30 [1] : vector<16x8xi32> to vector<16xi32>
    %80 = vector.shape_cast %79 : vector<16xi32> to vector<16x1xi32>
    %81 = vector.broadcast %80 : vector<16x1xi32> to vector<16x8xi32>
    %82 = arith.cmpi eq, %21, %81 : vector<16x8xi32>
    %83 = arith.extui %82 : vector<16x8xi1> to vector<16x8xi32>
    %84 = arith.sitofp %83 : vector<16x8xi32> to vector<16x8xf32>
    %cst_31 = arith.constant 0.000000e+00 : f32
    %85 = vector.broadcast %cst_31 : f32 to vector<16x1xf32>
    %86 = arith.cmpf ole, %74, %85 : vector<16x1xf32>
    %cst_32 = arith.constant 1.000000e+00 : f32
    %87 = vector.broadcast %cst_32 : f32 to vector<16x1xf32>
    %88 = arith.select %86, %87, %74 : vector<16x1xi1>, vector<16x1xf32>
    %cst_33 = arith.constant 1.000000e+00 : f32
    %89 = vector.broadcast %cst_33 : f32 to vector<16x1xf32>
    %90 = arith.divf %89, %88 : vector<16x1xf32>
    %91 = vector.broadcast %90 : vector<16x1xf32> to vector<16x8xf32>
    %92 = arith.mulf %84, %91 : vector<16x8xf32>
    %93 = arith.addf %68, %92 : vector<16x8xf32>
    %cst_34 = arith.constant dense<0.000000e+00> : vector<16x3xf32>
    %94 = tpu.matmul %34, %3, %cst_34 {dimension_numbers = #tpu.dot_dimension_numbers<[1], [0], [0], [1], [0, 0, 1, 1], [], []>} : vector<16x8xf32>, vector<8x3xf32>, vector<16x3xf32> -> vector<16x3xf32>
    %95 = arith.subf %1, %94 : vector<16x3xf32>
    %96 = arith.mulf %95, %95 : vector<16x3xf32>
    %cst_35 = arith.constant dense<0.000000e+00> : vector<16xf32>
    %97 = vector.multi_reduction <add>, %96, %cst_35 [1] : vector<16x3xf32> to vector<16xf32>
    %98 = vector.shape_cast %97 : vector<16xf32> to vector<16x1xf32>
    %cst_36 = arith.constant 0.000000e+00 : f32
    %99 = vector.broadcast %cst_36 : f32 to vector<16x1xf32>
    %100 = arith.cmpf ole, %98, %99 : vector<16x1xf32>
    %cst_37 = arith.constant dense<0.000000e+00> : vector<16xf32>
    %101 = vector.multi_reduction <add>, %93, %cst_37 [1] : vector<16x8xf32> to vector<16xf32>
    %102 = vector.shape_cast %101 : vector<16xf32> to vector<16x1xf32>
    %cst_38 = arith.constant 1.000000e+00 : f32
    %103 = vector.broadcast %cst_38 : f32 to vector<16x1xf32>
    %104 = arith.divf %103, %102 : vector<16x1xf32>
    %105 = vector.broadcast %104 : vector<16x1xf32> to vector<16x8xf32>
    %106 = arith.mulf %93, %105 : vector<16x8xf32>
    %107 = vector.shape_cast %100 : vector<16x1xi1> to vector<16x1xi1>
    %108 = vector.broadcast %107 : vector<16x1xi1> to vector<16x8xi1>
    %109 = arith.select %108, %34, %106 : vector<16x8xi1>, vector<16x8xf32>
    %cst_39 = arith.constant dense<0.000000e+00> : vector<16x8xf32>
    %110 = tpu.matmul %109, %5, %cst_39 {dimension_numbers = #tpu.dot_dimension_numbers<[1], [0], [0], [1], [0, 0, 1, 1], [], []>} : vector<16x8xf32>, vector<8x8xf32>, vector<16x8xf32> -> vector<16x8xf32>
    %c0_40 = arith.constant 0 : index
    %c0_41 = arith.constant 0 : index
    %111 = vector.load %arg6[%c0_40, %c0_41] : memref<8x32xf32, #tpu.memory_space<vmem>>, vector<8x32xf32>
    %c0_42 = arith.constant 0 : index
    %c0_43 = arith.constant 0 : index
    %112 = vector.load %arg7[%c0_42, %c0_43] : memref<8x32xf32, #tpu.memory_space<vmem>>, vector<8x32xf32>
    %c0_44 = arith.constant 0 : index
    %c0_45 = arith.constant 0 : index
    %113 = vector.load %arg8[%c0_44, %c0_45] : memref<1x32xf32, #tpu.memory_space<vmem>>, vector<1x32xf32>
    %c0_46 = arith.constant 0 : index
    %c0_47 = arith.constant 0 : index
    %c0_48 = arith.constant 0 : index
    %114 = vector.load %arg5[%c0_46, %c0_47, %c0_48] : memref<1x16x8xf32, #tpu.memory_space<vmem>>, vector<1x16x8xf32>
    %115 = vector.shape_cast %114 : vector<1x16x8xf32> to vector<16x8xf32>
    %cst_49 = arith.constant dense<0.000000e+00> : vector<16x32xf32>
    %116 = tpu.matmul %115, %111, %cst_49 {dimension_numbers = #tpu.dot_dimension_numbers<[1], [0], [0], [1], [0, 0, 1, 1], [], []>} : vector<16x8xf32>, vector<8x32xf32>, vector<16x32xf32> -> vector<16x32xf32>
    %cst_50 = arith.constant dense<0.000000e+00> : vector<16x32xf32>
    %117 = tpu.matmul %110, %112, %cst_50 {dimension_numbers = #tpu.dot_dimension_numbers<[1], [0], [0], [1], [0, 0, 1, 1], [], []>} : vector<16x8xf32>, vector<8x32xf32>, vector<16x32xf32> -> vector<16x32xf32>
    %118 = arith.addf %116, %117 : vector<16x32xf32>
    %119 = vector.broadcast %113 : vector<1x32xf32> to vector<16x32xf32>
    %120 = arith.addf %118, %119 : vector<16x32xf32>
    %cst_51 = arith.constant 0.000000e+00 : f32
    %121 = vector.broadcast %cst_51 : f32 to vector<16x32xf32>
    %122 = arith.maximumf %120, %121 : vector<16x32xf32>
    %c0_52 = arith.constant 0 : index
    %c0_53 = arith.constant 0 : index
    %123 = vector.load %arg9[%c0_52, %c0_53] : memref<32x16xf32, #tpu.memory_space<vmem>>, vector<32x16xf32>
    %c0_54 = arith.constant 0 : index
    %c0_55 = arith.constant 0 : index
    %124 = vector.load %arg10[%c0_54, %c0_55] : memref<1x16xf32, #tpu.memory_space<vmem>>, vector<1x16xf32>
    %cst_56 = arith.constant dense<0.000000e+00> : vector<16x16xf32>
    %125 = tpu.matmul %122, %123, %cst_56 {dimension_numbers = #tpu.dot_dimension_numbers<[1], [0], [0], [1], [0, 0, 1, 1], [], []>} : vector<16x32xf32>, vector<32x16xf32>, vector<16x16xf32> -> vector<16x16xf32>
    %126 = vector.broadcast %124 : vector<1x16xf32> to vector<16x16xf32>
    %127 = arith.addf %125, %126 : vector<16x16xf32>
    %cst_57 = arith.constant 0.000000e+00 : f32
    %128 = vector.broadcast %cst_57 : f32 to vector<16x16xf32>
    %129 = arith.maximumf %127, %128 : vector<16x16xf32>
    %c0_58 = arith.constant 0 : index
    %c0_59 = arith.constant 0 : index
    %c0_60 = arith.constant 0 : index
    %130 = vector.load %arg11[%c0_58, %c0_59, %c0_60] : memref<1x16x16xf32, #tpu.memory_space<vmem>>, vector<1x16x16xf32>
    %131 = vector.shape_cast %130 : vector<1x16x16xf32> to vector<16x16xf32>
    %132 = vector.shape_cast %129 : vector<16x16xf32> to vector<1x16x16xf32>
    tpu.vector_store %arg11[%c0_58, %c0_59, %c0_60], %132 {strides = array<i32>} : memref<1x16x16xf32, #tpu.memory_space<vmem>>, vector<1x16x16xf32>,
    return
  }
  func.func @transform_0(%arg0: i32, %arg1: i32) -> (i32, i32, i32) {
    %c0_i32 = arith.constant 0 : i32
    %c0_i32_0 = arith.constant 0 : i32
    return %arg0, %arg1, %c0_i32 : i32, i32, i32
  }
  func.func @transform_1(%arg0: i32, %arg1: i32) -> (i32, i32, i32) {
    %c0_i32 = arith.constant 0 : i32
    %c0_i32_0 = arith.constant 0 : i32
    %c0_i32_1 = arith.constant 0 : i32
    return %arg0, %c0_i32, %c0_i32_0 : i32, i32, i32
  }
  func.func @transform_2(%arg0: i32, %arg1: i32) -> (i32, i32, i32) {
    %c0_i32 = arith.constant 0 : i32
    %c0_i32_0 = arith.constant 0 : i32
    %c0_i32_1 = arith.constant 0 : i32
    return %arg0, %c0_i32, %c0_i32_0 : i32, i32, i32
  }
  func.func @transform_3(%arg0: i32, %arg1: i32) -> (i32, i32, i32) {
    %c0_i32 = arith.constant 0 : i32
    %c0_i32_0 = arith.constant 0 : i32
    return %arg0, %arg1, %c0_i32 : i32, i32, i32
  }
  func.func @transform_4(%arg0: i32, %arg1: i32) -> (i32, i32) {
    %c0_i32 = arith.constant 0 : i32
    %c0_i32_0 = arith.constant 0 : i32
    %c0_i32_1 = arith.constant 0 : i32
    return %c0_i32, %c0_i32_0 : i32, i32
  }
  func.func @transform_5(%arg0: i32, %arg1: i32) -> (i32, i32) {
    %c0_i32 = arith.constant 0 : i32
    %c0_i32_0 = arith.constant 0 : i32
    %c0_i32_1 = arith.constant 0 : i32
    return %c0_i32, %c0_i32_0 : i32, i32
  }
  func.func @transform_6(%arg0: i32, %arg1: i32) -> (i32, i32) {
    %c0_i32 = arith.constant 0 : i32
    %c0_i32_0 = arith.constant 0 : i32
    %c0_i32_1 = arith.constant 0 : i32
    return %c0_i32, %c0_i32_0 : i32, i32
  }
  func.func @transform_7(%arg0: i32, %arg1: i32) -> (i32, i32) {
    %c0_i32 = arith.constant 0 : i32
    %c0_i32_0 = arith.constant 0 : i32
    %c0_i32_1 = arith.constant 0 : i32
    return %c0_i32, %c0_i32_0 : i32, i32
  }
  func.func @transform_8(%arg0: i32, %arg1: i32) -> (i32, i32) {
    %c0_i32 = arith.constant 0 : i32
    %c0_i32_0 = arith.constant 0 : i32
    %c0_i32_1 = arith.constant 0 : i32
    return %c0_i32, %c0_i32_0 : i32, i32
  }
  func.func @transform_9(%arg0: i32, %arg1: i32) -> (i32, i32, i32) {
    %c0_i32 = arith.constant 0 : i32
    %c0_i32_0 = arith.constant 0 : i32
    return %arg0, %arg1, %c0_i32 : i32, i32, i32
  }
}

</mosaic_0001>

<bundles_post_ra>
// kernel: fp_forward.1
= control target key start
LH: loop header
LB: loop body
LE: loop exit
PB: predicated region body
PF: predicated region fallthrough
CT: control target
= control target key end

     0   :  { %14 = vsyncpa [#allocation3], 0  ;;  %s1915_s0 = inlined_call_operand.vmem [shape: f32[2,16,3], index: 0, kind: input, shape index: {}]   ;;  %s1916_s1 = inlined_call_operand.vmem [shape: f32[2,8,3], index: 1, kind: input, shape index: {}]   ;;  %s1917_s2 = inlined_call_operand.vmem [shape: f32[2,8,8], index: 2, kind: input, shape index: {}]   ;;  %s1918_s3 = inlined_call_operand.vmem [shape: f32[2,16,8], index: 3, kind: input, shape index: {}]   ;;  %s1919_s4 = inlined_call_operand.vmem [shape: f32[8,32], index: 4, kind: input, shape index: {}]   ;;  %s1920_s5 = inlined_call_operand.vmem [shape: f32[8,32], index: 5, kind: input, shape index: {}]   ;;  %s1921_s6 = inlined_call_operand.vmem [shape: f32[1,32], index: 6, kind: input, shape index: {}]   ;;  %s1922_s7 = inlined_call_operand.vmem [shape: f32[32,16], index: 7, kind: input, shape index: {}]   ;;  %s1923_s8 = inlined_call_operand.vmem [shape: f32[1,16], index: 8, kind: input, shape index: {}]   ;;  %s1924_s9 = inlined_call_operand.hbm [shape: f32[2,16,16], index: 9, kind: output, shape index: {}]  }
   0x1   :  { %16 = vsyncpa [#allocation3 + $0x1], 0  ;;  %s1652_s30 = smov 0   ;;  %s1654_s10 = smov 0  }
   0x2   :  { %s1656_s11 = smov 0   ;;  %s1658_s12 = smov 0  }
   0x3   :  { %s1660_s13 = smov 0   ;;  %s1662_s14 = smov 0  }
   0x4 LB: > { %s1348_s15 = sadd.s32 4294967295, %s1596_s14   ;;  %s1349_s16 = sadd.s32 4294967294, %s1596_s14   ;;  %s1596_s14 = sphi %s1662_s14, %s22_s14   ;;  %s1592_s13 = sphi %s1660_s13, %s1931_s13   ;;  %s1588_s12 = sphi %s1658_s12, %s1930_s12   ;;  %s1584_s11 = sphi %s1656_s11, %s1929_s11   ;;  %s1580_s10 = sphi %s1654_s10, %s1928_s10   ;;  %s1576_s30 = sphi %s1652_s30, %s1927_s30  }
   0x5   : > { %s34_s17 = sadd.s32 1, %s1592_s13  ;;  %s256_s18 = sadd.s32 1, %s1584_s11 }
   0x6   : > { %p36_p0 = scmp.ge.s32.totalorder %s34_s17, 2  ;;  %p266_p1 = scmp.ne.s32.totalorder %s1584_s11, %s1580_s10 }
   0x7   : > { %p267_p2 = scmp.eq.s32.totalorder %s1348_s15, 1  ;;  %p272_p3 = scmp.ne.s32.totalorder %s1580_s10, %s1576_s30 }
   0x8   : > { %s1933_s17 = smov (%p36_p0, %s34_s17), 0  ;;  %p273_p5 = scmp.eq.s32.totalorder %s1349_s16, 1 }
   0x9   : > { %p1692_p4 = por %p267_p2, %p266_p1  ;;  %s251_s20 = ssub.s32 %s1592_s13, %s1933_s17 }
   0xa   : > { %p1352_p6 = scmp.ge.s32.totalorder %s1596_s14, 1  ;;  %p254_p7 = scmp.eq.s32.totalorder %s251_s20, 0 }
   0xb   : > { %p1699_p8 = por %p273_p5, %p272_p3  ;;  %p346_p9 = scmp.lt.s32.totalorder %s1596_s14, 3 }
   0xc   : > { %s1705_s22 = scalar_select %p254_p7, %s1584_s11, %s256_s18  }
   0xd   : > { %p347_p10 = pnand %p1352_p6, %p346_p9 }
   0xe   : > { %p404_p11 = scmp.lt.s32.totalorder (!%p347_p10), %s1588_s12, 1 }
   0xf   : > { %350 = sbr.rel (%p347_p10) target bundleno = 2300 (0x8fc), region = 56 }
  0x14   : > { %s1709_s23 = scalar_select %p404_p11, %s1588_s12, 1  ;;  %vm438_vm0 = vcmask 23552   ;;  %v534_v9 = vlaneseq  ;;  %vm561_vm1 = vcmask 64512   ;;  %v1598_v57 = vmov 0.0  }
  0x16   : > { %s1356_s24 = sshll.u32 %s1709_s23, 3  ;;  %s1386_s25 = sshll.u32 %s1709_s23, 4  ;;  %v1740_v10 = vand.u32 127, %v534_v9  ;;  %v537_v11 = vshrl.u32 %v534_v9, 7 }
  0x17   : > { %s416_s28 = scalar_lea.vmem %s1916_s1, %s1356_s24  ;;  %s411_s16 = scalar_lea.vmem %s1915_s0, %s1386_s25 }
  0x18   : > { %v434_v0 = vld [vmem:[%s416_s28] sm:$0xff]  ;;  %v1725_v2 = vld [vmem:[%s411_s16 + $0x8] sm:$0xff]  ;;  %v538_v12 = vsub.s32 %v1740_v10, %v537_v11  ;;  %s420_s26 = scalar_lea.vmem %s1917_s2, %s1356_s24  ;;  %s429_s18 = scalar_lea.vmem %s1918_s3, %s1386_s25 }
  0x19   : > { %v1723_v1 = vld [vmem:[%s411_s16] sm:$0xff]  ;;  %1410 = vmatprep.subr.msk.mxu0 %vm438_vm0, %v434_v0  ;;  %v445_v3 = vmul.f32 %v434_v0, %v434_v0  ;;  %v437_v4 = vmul.f32 %v1725_v2, %v1725_v2  ;;  %1415 = vmatprep.subr.mxu1 %v434_v0  ;;  %s1388_s28 = sshll.u32 %s1588_s12, 8 }
  0x1a   : > { %1412 = vmatprep.mubr.msk.f32.mxu0 %vm438_vm0, %v1723_v1  ;;  %v436_v5 = vmul.f32 %v1723_v1, %v1723_v1  ;;  %1411 = vmatpush3.xpose.msk.msra.mxu0 %vm438_vm0, %v434_v0  ;;  %s1868_s15 = scalar_lea.hbm %s1924_s9, %s1388_s28 }
  0x1b   : > { %v446_v6 = vsel %vm438_vm0, %v445_v3, 0.0  ;;  %v442_v7 = vsel %vm438_vm0, %v437_v4, 0.0  ;;  %1416 = vmatpush3.msra.mxu1 %v434_v0 }
  0x1c   : > { %447 = vadd.xlane.f32.xlu0 %v446_v6  ;;  %443 = vadd.xlane.f32.xlu1 %v442_v7  ;;  %v439_v8 = vsel %vm438_vm0, %v436_v5, 0.0 }
  0x1d   : > { %1413 = vmatmul.mubr.msk.f32.vlgmr.msra.gmra.mxu0 %vm438_vm0, %v1725_v2 }
  0x20   : > { %440 = vadd.xlane.f32.xlu0 %v439_v8 }
  0xa5   : > { %v448_v13 = vpop.xlane.xlu0 %447  ;;  %v444_v15 = vpop.xlane.xlu1 %443 }
  0xa6   : > { %v539_v14 = vrot.slane %v448_v13, %v538_v12 }
  0xa8   : > { %v554_v16 = vadd.f32 %v539_v14, %v444_v15 }
  0xa9   : > { %v441_v18 = vpop.xlane.xlu0 %440 }
  0xaa   : > { %v553_v22 = vadd.f32 %v539_v14, %v441_v18 }
  0xdd   : > { %v1414_v17 = vpop.f32.mrf.mxu0 }
  0xde   : > { %v556_v19 = vmul.f32 2.0, %v1414_v17 }
  0xdf   : > { %v524_v20 = vpop.f32.mrf.mxu0 }
  0xe0   : > { %v558_v21 = vsub.f32 %v554_v16, %v556_v19  ;;  %v555_v23 = vmul.f32 2.0, %v524_v20 }
  0xe2   : > { %v560_v24 = vmax.f32 %v558_v21, 0.0  ;;  %v557_v25 = vsub.f32 %v553_v22, %v555_v23 }
  0xe4   : > { %v559_v26 = vmax.f32 %v557_v25, 0.0  ;;  %v565_v27 = vsel %vm561_vm1, %v560_v24, inf }
  0xe5   : > { %566 = vmin.xlane.f32.xlu0 %v565_v27 }
  0xe6   : > { %v562_v28 = vsel %vm561_vm1, %v559_v26, inf }
  0xe7   : > { %563 = vmin.xlane.f32.xlu1 %v562_v28 }
 0x16e   : > { %v1745_v29 = vpop.xlane.xlu0 %566 }
 0x16f   : > { %vm569_vm2 = vcmp.eq.f32.partialorder %v560_v24, %v1745_v29 }
 0x170   : > { %v1748_v30 = vpop.xlane.xlu1 %563  ;;  %v571_v31 = vsel %vm569_vm2, %v1740_v10, 8 }
 0x171   : > { %vm568_vm3 = vcmp.eq.f32.partialorder %v559_v26, %v1748_v30  ;;  %v587_v32 = vsel %vm561_vm1, %v571_v31, 2147483647 }
 0x172   : > { %v589_v33 = vshra.s32 %v587_v32, 16  ;;  %v570_v34 = vsel %vm568_vm3, %v1740_v10, 8  ;;  %v588_v39 = vand.u32 65535, %v587_v32 }
 0x173   : > { %v572_v35 = vsel %vm561_vm1, %v570_v34, 2147483647 }
 0x174   : > { %v591_v36 = vcvt.s32.f32 %v589_v33  ;;  %v574_v37 = vshra.s32 %v572_v35, 16  ;;  %v573_v40 = vand.u32 65535, %v572_v35  ;;  %v590_v42 = vcvt.s32.f32 %v588_v39 }
 0x176   : > { %592 = vmin.xlane.f32.xlu0 %v591_v36  ;;  %v576_v38 = vcvt.s32.f32 %v574_v37  ;;  %v575_v45 = vcvt.s32.f32 %v573_v40 }
 0x178   : > { %577 = vmin.xlane.f32.xlu1 %v576_v38 }
 0x1ff   : > { %v593_v41 = vpop.xlane.xlu0 %592 }
 0x200   : > { %vm594_vm4 = vcmp.eq.f32.partialorder %v591_v36, %v593_v41  ;;  %v599_v47 = vcvt.f32.s32 %v593_v41 }
 0x201   : > { %v578_v43 = vpop.xlane.xlu1 %577  ;;  %v595_v44 = vsel %vm594_vm4, %v590_v42, inf }
 0x202   : > { %596 = vmin.xlane.f32.xlu0 %v595_v44  ;;  %vm579_vm5 = vcmp.eq.f32.partialorder %v576_v38, %v578_v43  ;;  %v584_v48 = vcvt.f32.s32 %v578_v43  ;;  %v600_v50 = vshll.u32 %v599_v47, 16 }
 0x203   : > { %v580_v46 = vsel %vm579_vm5, %v575_v45, inf }
 0x204   : > { %581 = vmin.xlane.f32.xlu1 %v580_v46  ;;  %v585_v53 = vshll.u32 %v584_v48, 16 }
 0x28b   : > { %v597_v49 = vpop.xlane.xlu0 %596 }
 0x28c   : > { %v598_v51 = vcvt.f32.s32 %v597_v49 }
 0x28d   : > { %v582_v52 = vpop.xlane.xlu1 %581 }
 0x28e   : > { %v601_v54 = vadd.s32 %v600_v50, %v598_v51  ;;  %v583_v55 = vcvt.f32.s32 %v582_v52 }
 0x290   : > { %v586_v56 = vadd.s32 %v585_v53, %v583_v55  ;;  %vm603_vm6 = vcmp.eq.s32.totalorder %v1740_v10, %v601_v54 }
 0x291   : > { %v1757_v58 = vsel %vm603_vm6, 1.0, %v1598_v57 }
 0x292   : > { %vm602_vm7 = vcmp.eq.s32.totalorder %v1740_v10, %v586_v56  ;;  %vm621_vm8 = vcmp.gt.f32.partialorder %v1757_v58, 0.0 }
 0x293   : > { %v1762_v59 = vsel %vm602_vm7, 1.0, %v1598_v57  ;;  %v623_v60 = vsel %vm621_vm8, inf, %v560_v24 }
 0x294   : > { %1417 = vmatprep.mubr.msk.f32.mxu1 %vm561_vm1, %v1762_v59  ;;  %v627_v61 = vsel %vm561_vm1, %v623_v60, inf  ;;  %vm620_vm9 = vcmp.gt.f32.partialorder %v1762_v59, 0.0 }
 0x295   : > { %1418 = vmatmul.mubr.msk.f32.vlgmr.msra.gmra.mxu1 %vm561_vm1, %v1757_v58  ;;  %628 = vmin.xlane.f32.xlu0 %v627_v61  ;;  %v622_v62 = vsel %vm620_vm9, inf, %v559_v26  ;;  %vm609_vm9 = vcmp.le.f32.partialorder %v1745_v29, 0.0 }
 0x296   : > { %v624_v63 = vsel %vm561_vm1, %v622_v62, inf  ;;  %v611_v61 = vsel %vm609_vm9, 1.0, %v1745_v29 }
 0x297   : > { %625 = vmin.xlane.f32.xlu1 %v624_v63 }
 0x31e   : > { %v1771_v0 = vpop.xlane.xlu0 %628 }
 0x31f   : > { %vm631_vm10 = vcmp.eq.f32.partialorder %v623_v60, %v1771_v0  ;;  %vm671_vm8 = vcmp.le.f32.partialorder %v1771_v0, 0.0 }
 0x320   : > { %v1774_v3 = vpop.xlane.xlu1 %625  ;;  %v633_v4 = vsel %vm631_vm10, %v1740_v10, 8 }
 0x321   : > { %vm630_vm11 = vcmp.eq.f32.partialorder %v622_v62, %v1774_v3  ;;  %v649_v5 = vsel %vm561_vm1, %v633_v4, 2147483647  ;;  %vm670_vm10 = vcmp.le.f32.partialorder %v1774_v3, 0.0 }
 0x322   : > { %v651_v6 = vshra.s32 %v649_v5, 16  ;;  %v632_v7 = vsel %vm630_vm11, %v1740_v10, 8  ;;  %v650_v13 = vand.u32 65535, %v649_v5  ;;  %vm608_vm11 = vcmp.le.f32.partialorder %v1748_v30, 0.0 }
 0x323   : > { %v634_v8 = vsel %vm561_vm1, %v632_v7, 2147483647  ;;  %v610_v63 = vsel %vm608_vm11, 1.0, %v1748_v30 }
 0x324   : > { %v653_v9 = vcvt.s32.f32 %v651_v6  ;;  %v636_v11 = vshra.s32 %v634_v8, 16  ;;  %v635_v14 = vand.u32 65535, %v634_v8  ;;  %v652_v16 = vcvt.s32.f32 %v650_v13 }
 0x326   : > { %654 = vmin.xlane.f32.xlu0 %v653_v9  ;;  %v638_v12 = vcvt.s32.f32 %v636_v11  ;;  %v637_v19 = vcvt.s32.f32 %v635_v14 }
 0x328   : > { %639 = vmin.xlane.f32.xlu1 %v638_v12 }
 0x355   : > { %v1419_v11 = vpop.f32.mrf.mxu1 }
 0x3af   : > { %v655_v15 = vpop.xlane.xlu0 %654 }
 0x3b0   : > { %vm656_vm12 = vcmp.eq.f32.partialorder %v653_v9, %v655_v15  ;;  %v661_v21 = vcvt.f32.s32 %v655_v15 }
 0x3b1   : > { %v640_v17 = vpop.xlane.xlu1 %639  ;;  %v657_v18 = vsel %vm656_vm12, %v652_v16, inf }
 0x3b2   : > { %658 = vmin.xlane.f32.xlu0 %v657_v18  ;;  %vm641_vm13 = vcmp.eq.f32.partialorder %v638_v12, %v640_v17  ;;  %v646_v22 = vcvt.f32.s32 %v640_v17  ;;  %v662_v24 = vshll.u32 %v661_v21, 16 }
 0x3b3   : > { %v642_v20 = vsel %vm641_vm13, %v637_v19, inf }
 0x3b4   : > { %643 = vmin.xlane.f32.xlu1 %v642_v20  ;;  %v647_v27 = vshll.u32 %v646_v22, 16  ;;  %v816_v22 = vpop.f32.mrf.mxu1 }
 0x43b   : > { %v659_v23 = vpop.xlane.xlu0 %658 }
 0x43c   : > { %v660_v25 = vcvt.f32.s32 %v659_v23 }
 0x43d   : > { %v644_v26 = vpop.xlane.xlu1 %643 }
 0x43e   : > { %v663_v28 = vadd.s32 %v662_v24, %v660_v25  ;;  %v645_v31 = vcvt.f32.s32 %v644_v26  ;;  %v826_v25 = vsub.f32 %v1725_v2, %v1419_v11  ;;  %v1378_v11 = vld [vmem:[%s1923_s8] ss:$0 sm:$0xff] }
 0x440   : > { %v648_v32 = vadd.s32 %v647_v27, %v645_v31  ;;  %vm665_vm14 = vcmp.eq.s32.totalorder %v1740_v10, %v663_v28 }
 0x441   : > { %v1783_v33 = vsel %vm665_vm14, 1.0, %v1598_v57 }
 0x442   : > { %vm683_vm15 = vcmp.gt.f32.partialorder %v1783_v33, 0.0  ;;  %vm664_vm2 = vcmp.eq.s32.totalorder %v1740_v10, %v648_v32  ;;  %v825_v32 = vsub.f32 %v1723_v1, %v816_v22  ;;  %v435_v1 = vld [vmem:[%s420_s26] sm:$0xff] }
 0x443   : > { %v685_v34 = vsel %vm683_vm15, inf, %v623_v60  ;;  %v1788_v35 = vsel %vm664_vm2, 1.0, %v1598_v57  ;;  %v673_v60 = vsel %vm671_vm8, 1.0, %v1771_v0  ;;  %1420 = vmatprep.subr.mxu1 %v435_v1 }
 0x444   : > { %v689_v36 = vsel %vm561_vm1, %v685_v34, inf  ;;  %vm682_vm3 = vcmp.gt.f32.partialorder %v1788_v35, 0.0  ;;  %1504 = vrcp.f32 %v673_v60  ;;  %1421 = vmatpush3.msra.mxu1 %v435_v1  ;;  %v1113_v60 = vld [vmem:[%s1922_s7] sm:$0xff] }
 0x445   : > { %690 = vmin.xlane.f32.xlu0 %v689_v36  ;;  %v684_v37 = vsel %vm682_vm3, inf, %v622_v62  ;;  %v672_v62 = vsel %vm670_vm10, 1.0, %v1774_v3  ;;  %1506 = vrcp.f32 %v611_v61  ;;  %v828_v36 = vmul.f32 %v826_v25, %v826_v25 }
 0x446   : > { %v686_v38 = vsel %vm561_vm1, %v684_v37, inf  ;;  %1508 = vrcp.f32 %v672_v62  ;;  %vm1208_vm3 = vcmask 130048  }
 0x447   : > { %687 = vmin.xlane.f32.xlu1 %v686_v38  ;;  %1510 = vrcp.f32 %v610_v63 }
 0x451   : > { %v1505_v29 = vpop.eup %1504 }
 0x452   : > { %v1507_v3 = vpop.eup %1506  ;;  %v679_v30 = vmul.f32 %v1505_v29, %v1783_v33 }
 0x453   : > { %v1509_v16 = vpop.eup %1508  ;;  %v617_v20 = vmul.f32 %v1507_v3, %v1757_v58 }
 0x454   : > { %v1511_v17 = vpop.eup %1510  ;;  %v678_v18 = vmul.f32 %v1509_v16, %v1788_v35 }
 0x455   : > { %v616_v24 = vmul.f32 %v1511_v17, %v1762_v59  ;;  %v681_v26 = vadd.f32 %v679_v30, %v617_v20 }
 0x4ce   : > { %v691_v39 = vpop.xlane.xlu0 %690 }
 0x4cf   : > { %vm693_vm4 = vcmp.eq.f32.partialorder %v685_v34, %v691_v39  ;;  %vm733_vm12 = vcmp.le.f32.partialorder %v691_v39, 0.0  ;;  %v680_v34 = vadd.f32 %v678_v18, %v616_v24 }
 0x4d0   : > { %v688_v40 = vpop.xlane.xlu1 %687  ;;  %v695_v41 = vsel %vm693_vm4, %v1740_v10, 8  ;;  %v735_v4 = vsel %vm733_vm12, 1.0, %v691_v39  ;;  %v827_v39 = vmul.f32 %v825_v32, %v825_v32 }
 0x4d1   : > { %vm692_vm5 = vcmp.eq.f32.partialorder %v684_v37, %v688_v40  ;;  %v711_v42 = vsel %vm561_vm1, %v695_v41, 2147483647  ;;  %vm732_vm13 = vcmp.le.f32.partialorder %v688_v40, 0.0  ;;  %1512 = vrcp.f32 %v735_v4  ;;  %v1377_v4 = vld [vmem:[%s1921_s6] ss:$0 sm:$0xff] }
 0x4d2   : > { %v713_v43 = vshra.s32 %v711_v42, 16  ;;  %v694_v44 = vsel %vm692_vm5, %v1740_v10, 8  ;;  %v712_v49 = vand.u32 65535, %v711_v42  ;;  %v734_v5 = vsel %vm732_vm13, 1.0, %v688_v40  ;;  %v937_v40 = vld [vmem:[%s1920_s5] sm:$0xff] }
 0x4d3   : > { %v696_v45 = vsel %vm561_vm1, %v694_v44, 2147483647  ;;  %1514 = vrcp.f32 %v734_v5  ;;  %1425 = vmatprep.subr.mxu1 %v937_v40 }
 0x4d4   : > { %v715_v46 = vcvt.s32.f32 %v713_v43  ;;  %v698_v47 = vshra.s32 %v696_v45, 16  ;;  %v697_v50 = vand.u32 65535, %v696_v45  ;;  %v714_v52 = vcvt.s32.f32 %v712_v49 }
 0x4d6   : > { %716 = vmin.xlane.f32.xlu0 %v715_v46  ;;  %v700_v48 = vcvt.s32.f32 %v698_v47  ;;  %v699_v55 = vcvt.s32.f32 %v697_v50 }
 0x4d8   : > { %701 = vmin.xlane.f32.xlu1 %v700_v48 }
 0x4de   : > { %v1513_v21 = vpop.eup %1512 }
 0x4e0   : > { %v1515_v28 = vpop.eup %1514 }
 0x55f   : > { %v717_v51 = vpop.xlane.xlu0 %716 }
 0x560   : > { %vm718_vm6 = vcmp.eq.f32.partialorder %v715_v46, %v717_v51  ;;  %v723_v6 = vcvt.f32.s32 %v717_v51  ;;  %v936_v51 = vld [vmem:[%s1919_s4] sm:$0xff] }
 0x561   : > { %v702_v53 = vpop.xlane.xlu1 %701  ;;  %v719_v54 = vsel %vm718_vm6, %v714_v52, inf }
 0x562   : > { %720 = vmin.xlane.f32.xlu0 %v719_v54  ;;  %vm703_vm7 = vcmp.eq.f32.partialorder %v700_v48, %v702_v53  ;;  %v708_v7 = vcvt.f32.s32 %v702_v53  ;;  %v724_v0 = vshll.u32 %v723_v6, 16  ;;  %v1116_v54 = vld [vmem:[%s1922_s7 + $0x18] sm:$0xff] }
 0x563   : > { %v704_v56 = vsel %vm703_vm7, %v699_v55, inf  ;;  %1435 = vmatprep.subr.mxu0 %v1116_v54  ;;  %v1115_v55 = vld [vmem:[%s1922_s7 + $0x10] sm:$0xff] }
 0x564   : > { %705 = vmin.xlane.f32.xlu1 %v704_v56  ;;  %v709_v13 = vshll.u32 %v708_v7, 16  ;;  %1436 = vmatpush3.msra.mxu0 %v1116_v54  ;;  %v1114_v56 = vld [vmem:[%s1922_s7 + $0x8] sm:$0xff] }
 0x565   : > { %1437 = vmatprep.subr.mxu0 %v1115_v55 }
 0x566   : > { %1438 = vmatpush3.msra.mxu0 %v1115_v55 }
 0x567   : > { %1439 = vmatprep.subr.mxu0 %v1114_v56 }
 0x568   : > { %1440 = vmatpush3.msra.mxu0 %v1114_v56 }
 0x569   : > { %1441 = vmatprep.subr.mxu0 %v1113_v60 }
 0x56a   : > { %1442 = vmatpush3.msra.mxu0 %v1113_v60 }
 0x5eb   : > { %v721_v8 = vpop.xlane.xlu0 %720 }
 0x5ec   : > { %v722_v9 = vcvt.f32.s32 %v721_v8 }
 0x5ed   : > { %v706_v12 = vpop.xlane.xlu1 %705 }
 0x5ee   : > { %v725_v14 = vadd.s32 %v724_v0, %v722_v9  ;;  %v707_v15 = vcvt.f32.s32 %v706_v12 }
 0x5f0   : > { %vm727_vm14 = vcmp.eq.s32.totalorder %v1740_v10, %v725_v14  ;;  %v710_v19 = vadd.s32 %v709_v13, %v707_v15 }
 0x5f1   : > { %v1368_v23 = vsel %vm727_vm14, 1.0, %v1598_v57 }
 0x5f2   : > { %vm726_vm15 = vcmp.eq.s32.totalorder %v1740_v10, %v710_v19  ;;  %v741_v27 = vmul.f32 %v1513_v21, %v1368_v23  ;;  %v832_v10 = vsel %vm438_vm0, %v828_v36, 0.0 }
 0x5f3   : > { %v1367_v31 = vsel %vm726_vm15, 1.0, %v1598_v57  ;;  %v829_v57 = vsel %vm438_vm0, %v827_v39, 0.0 }
 0x5f4   : > { %v743_v33 = vadd.f32 %v741_v27, %v681_v26  ;;  %v740_v35 = vmul.f32 %v1515_v28, %v1367_v31 }
 0x5f6   : > { %v840_v37 = vsel %vm561_vm1, %v743_v33, 0.0  ;;  %v742_v38 = vadd.f32 %v740_v35, %v680_v34 }
 0x5f7   : > { %841 = vadd.xlane.f32.xlu0 %v840_v37 }
 0x5f8   : > { %v837_v2 = vsel %vm561_vm1, %v742_v38, 0.0 }
 0x5f9   : > { %838 = vadd.xlane.f32.xlu1 %v837_v2 }
 0x5fb   : > { %833 = vadd.xlane.f32.xlu0 %v832_v10 }
 0x5fd   : > { %830 = vadd.xlane.f32.xlu1 %v829_v57 }
 0x680   : > { %v842_v41 = vpop.xlane.xlu0 %841 }
 0x681   : > { %1516 = vrcp.f32 %v842_v41 }
 0x682   : > { %v839_v42 = vpop.xlane.xlu1 %838 }
 0x683   : > { %1518 = vrcp.f32 %v839_v42 }
 0x684   : > { %v834_v47 = vpop.xlane.xlu0 %833 }
 0x685   : > { %vm836_vm2 = vcmp.le.f32.partialorder %v834_v47, 0.0 }
 0x686   : > { %v831_v44 = vpop.xlane.xlu1 %830 }
 0x687   : > { %vm835_vm0 = vcmp.le.f32.partialorder %v831_v44, 0.0 }
 0x68e   : > { %v1517_v43 = vpop.eup %1516 }
 0x68f   : > { %v848_v46 = vmul.f32 %v1517_v43, %v743_v33 }
 0x690   : > { %v1519_v45 = vpop.eup %1518 }
 0x691   : > { %v847_v48 = vmul.f32 %v1519_v45, %v742_v38  ;;  %v854_v50 = vsel %vm836_vm2, %v1757_v58, %v848_v46  ;;  %v940_v58 = vld [vmem:[%s429_s18 + $0x8] sm:$0xff] }
 0x693   : > { %v853_v49 = vsel %vm835_vm0, %v1762_v59, %v847_v48  ;;  %v939_v59 = vld [vmem:[%s429_s18] sm:$0xff]  ;;  %s400_s18 = sand.u32 1, %s1580_s10  }
 0x694   : > { %1422 = vmatprep.mubr.msk.f32.mxu1 %vm561_vm1, %v853_v49  ;;  %s1353_s20 = sshll.u32 %s400_s18, 4  ;;  %s1870_s16 = scalar_lea.sflag [#allocation3], %s400_s18 }
 0x695   : > { %1423 = vmatmul.mubr.msk.f32.vlgmr.msra.gmra.mxu1 %vm561_vm1, %v854_v50  ;;  %s402_s25 = scalar_lea.vmem [#allocation2], %s1353_s20  ;;  %s1599_s20 = smov [#allocation2]  }
 0x696   : > { %1426 = vmatpush3.msra.mxu1 %v937_v40  ;;  %s1227_s27 = sshll.u32 %s402_s25, 4  ;;  %s1524_s26 = sshll.u32 %s1599_s20, 4  ;;  %s1863_s27 = int_to_ptr.vmem [resolvable:$true] %s1227_s27  ;;  %s1525_s26 = int_to_ptr.vmem [resolvable:$false] %s1524_s26 }
 0x697   : > { %1430 = vmatprep.subr.mxu1 %v936_v51  ;;  %s1520_s12 = scalar_lea.vmem %s1863_s27, 256  ;;  %s1526_s23 = scalar_lea.vmem %s1525_s26, 512 }
 0x698   : > { %p1521_p12 = scmp.ne.s32.totalorder %s1863_s27, %s1520_s12  ;;  %p1527_p1 = scmp.lt.s32.totalorder %s1863_s27, %s1525_s26 }
 0x699   : > { %p1528_p2 = scmp.lt.s32.totalorder %s1526_s23, %s1520_s12 }
 0x69a   : > { %p1522_p13 = pnand %p1521_p12, %p1692_p4 }
 0x69b   : > { %p1529_p3 = por %p1528_p2, %p1527_p1 }
 0x69c   : > { %p1523_p0 = pneg %p1522_p13 }
 0x69e   : > { %p1530_p5 = pnand %p1529_p3, %p1523_p0 }
 0x755   : > { %v1424_v52 = vpop.f32.mrf.mxu1 }
 0x757   : > { %v927_v53 = vpop.f32.mrf.mxu1 }
 0x758   : > { %1427 = vmatprep.mubr.msk.f32.mxu1 %vm561_vm1, %v927_v53 }
 0x759   : > { %1428 = vmatmul.mubr.msk.f32.vlgmr.msra.gmra.mxu1 %vm561_vm1, %v1424_v52 }
 0x75a   : > { %1431 = vmatpush3.msra.mxu1 %v936_v51  ;;  %1432 = vmatprep.mubr.msk.f32.mxu1 %vm561_vm1, %v939_v59 }
 0x75d   : > { %1433 = vmatmul.mubr.msk.f32.vlgmr.msra.gmra.mxu1 %vm561_vm1, %v940_v58  ;;  %vm1124_vm1 = vcmask 261120  }
 0x819   : > { %v1429_v61 = vpop.f32.mrf.mxu1 }
 0x81b   : > { %v1013_v62 = vpop.f32.mrf.mxu1 }
 0x81d   : > { %v1434_v63 = vpop.f32.mrf.mxu1 }
 0x81e   : > { %v1100_v5 = vadd.f32 %v1434_v63, %v1429_v61 }
 0x81f   : > { %v1094_v6 = vpop.f32.mrf.mxu1 }
 0x820   : > { %v1095_v7 = vadd.f32 %v1094_v6, %v1013_v62  ;;  %v1110_v8 = vadd.f32 %v1377_v4, %v1100_v5 }
 0x822   : > { %v1109_v0 = vadd.f32 %v1377_v4, %v1095_v7  ;;  %v1112_v29 = vmax.f32 %v1110_v8, 0.0 }
 0x824   : > { %v1111_v9 = vmax.f32 %v1109_v0, 0.0 }
 0x826   : > { %1443 = vmatprep.mubr.msk.f32.mxu0 %vm1124_vm1, %v1111_v9 }
 0x827   : > { %1444 = vmatmul.mubr.msk.f32.vlgmr.msra.gmra.mxu0 %vm1124_vm1, %v1112_v29 }
 0x8e7   : > { %v1445_v12 = vpop.f32.mrf.mxu0 }
 0x8e8   : > { %v1203_v3 = vadd.f32 %v1445_v12, %v1378_v11 }
 0x8e9   : > { %v1197_v30 = vpop.f32.mrf.mxu0 }
 0x8ea   : > { %v1207_v13 = vmax.f32 %v1203_v3, 0.0  ;;  %v1198_v14 = vadd.f32 %v1378_v11, %v1197_v30 }
 0x8ec   : > { %1210 = vst.msk [vmem:[%s402_s25 + $0x8] sm:$0xff] %vm1208_vm3, %v1207_v13  ;;  %v1206_v15 = vmax.f32 %v1198_v14, 0.0 }
 0x8ee   : > { %1209 = vst.msk [vmem:[%s402_s25] sm:$0xff] %vm1208_vm3, %v1206_v15 }
 0x8ef   : > { %1533 = shalt.err (!%p1530_p5)
}
 0x8f0   : > { %s1534_s18 = scalar_lea.hbm %s1868_s15, 256  ;;  %s1538_s24 = scalar_lea.hbm %s1924_s9, 512 }
 0x8f1   : > { %p1535_p6 = scmp.ne.s32.totalorder %s1868_s15, %s1534_s18  ;;  %p1539_p10 = scmp.lt.s32.totalorder %s1868_s15, %s1924_s9 }
 0x8f2   : > { %p1540_p11 = scmp.lt.s32.totalorder %s1538_s24, %s1534_s18 }
 0x8f3   : > { %p1536_p7 = pnand %p1535_p6, %p1692_p4 }
 0x8f4   : > { %p1541_p12 = por %p1540_p11, %p1539_p10 }
 0x8f5   : > { %p1537_p9 = pneg %p1536_p7 }
 0x8f7   : > { %p1542_p13 = pnand %p1541_p12, %p1537_p9 }
 0x8f9   : > { %1545 = shalt.err (!%p1542_p13)
}
 0x8fa   : > { %s1600_s12 = smov 128   ;;  %s1601_s26 = smov 8  }
 0x8fb   : > { %1446 = dma.vmem_to_hbm [thread:$0]  (%p1692_p4), %s1863_s27, 256, %s1868_s15, %s1870_s16, %s1600_s12, %s1600_s12, %s1601_s26  }
 0x8fc PF: > { %p1452_p0 = scmp.ge.s32.totalorder %s1596_s14, 2  ;;  %s1242_s23 = sand.u32 1, %s1576_s30  }
 0x8fd   : > { %s1243_s18 = scalar_lea.sflag [#allocation3], %s1242_s23 }
 0x8fe   : > { %p1449_p1 = pnand %p1452_p0, %p1699_p8 }
 0x900   : > { %p1450_p2 = pneg %p1449_p1 }
 0x902   : > { %1571 = dma.done.wait (%p1450_p2), %s1243_s18, 256  }
 0x903   : > { %1573 = vsyncadd (%p1450_p2), %s1243_s18, 4294967040  ;;  %s22_s14 = sadd.s32 1, %s1596_s14   ;;  %s1927_s30 = smov %s1580_s10 }
 0x904   : > { %p19_p3 = scmp.ge.s32.totalorder %s22_s14, 4   ;;  %s1928_s10 = smov %s1584_s11 }
 0x905   : > { %s1929_s11 = smov %s1705_s22  ;;  %s1930_s12 = smov %s1592_s13 }
 0x906   : > { %s1931_s13 = smov %s1933_s17  ;;  %21 = sbr.rel (!%p19_p3) target bundleno = 4 (0x4), region = 100 }
 0x90b   :  { %1248 = vsyncpa [#allocation3], 1 }
 0x90c   :  { %1250 = vsyncpa [#allocation3 + $0x1], 1 }

</bundles_post_ra>
